<compile_context>
chip_gen: v6e
topology: v6e:2x2x1
jax: 0.10.0
libtpu: 0.0.40
codegen_flags: <defaults>
</compile_context>

<pallas_src>
import functools

import jax
import jax.numpy as jnp
from jax.experimental import pallas as pl
from jax.experimental.pallas import tpu as pltpu

KH = KW = 3
BN_EPS = 1e-5


def _round_up(x, m):
    return (x + m - 1) // m * m


def conv_stats_kernel(p_ref, w_ref, y_ref, sum_ref, sumsq_ref):
    """Per row-tile: one im2col matmul + single-pass BN partial stats.

    p_ref:     (TM, Kp)  im2col patch rows (zero-padded K and rows)
    w_ref:     (Kp, Cp)  weights (resident across the grid)
    y_ref:     (TM, Cp)  un-normalized conv output (tiled)
    sum_ref:   (1, Cp)   running per-channel sum   (resident accumulator)
    sumsq_ref: (1, Cp)   running per-channel sumsq (resident accumulator)
    """

    @pl.when(pl.program_id(0) == 0)
    def _init():
        sum_ref[...] = jnp.zeros_like(sum_ref)
        sumsq_ref[...] = jnp.zeros_like(sumsq_ref)

    y = jnp.dot(p_ref[...], w_ref[...], preferred_element_type=jnp.float32)
    y_ref[...] = y
    # Padded rows / channels contribute exactly zero to both sums, so they never
    # perturb the batch statistics (count below uses the *real* N*H*W).
    sum_ref[...] += jnp.sum(y, axis=0, keepdims=True)
    sumsq_ref[...] += jnp.sum(y * y, axis=0, keepdims=True)


def bn_relu_kernel(y_ref, sum_ref, sumsq_ref, gamma_ref, beta_ref, o_ref, *, count):
    """Per row-tile: apply BN (batch stats, biased var, eps=1e-5) + ReLU."""
    inv_count = 1.0 / count
    mean = sum_ref[...] * inv_count
    var = jnp.maximum(sumsq_ref[...] * inv_count - mean * mean, 0.0)
    scale = jax.lax.rsqrt(var + BN_EPS) * gamma_ref[...]
    shift = beta_ref[...] - mean * scale
    o_ref[...] = jnp.maximum(y_ref[...] * scale + shift, 0.0)


def conv_block_forward(x_nchw, w_oihw, gamma, beta, *, tile_rows=256):
    """Forward pass matching ConvBlock(in, out, k=3, s=1, p=1) in training mode.

    x_nchw: (N, Cin, H, W) float32
    w_oihw: (Cout, Cin, 3, 3) float32   (PyTorch Conv2d weight layout)
    gamma, beta: (Cout,) float32        (BatchNorm2d affine params)
    returns: (N, Cout, H, W) float32
    """
    N, Cin, H, W = x_nchw.shape
    Cout = w_oihw.shape[0]

    M = N * H * W                      # rows of the im2col matrix
    K = KH * KW * Cin                  # contraction depth
    Kp = _round_up(K, 128)             # lane-dense K
    Cp = _round_up(Cout, 128)          # lane-dense output channels
    TM = min(tile_rows, _round_up(M, 8))
    Mp = _round_up(M, TM)
    n_tiles = Mp // TM

    # ---- wrapper-side layout plumbing (done once, lane-dense slab for the kernels) ----
    # NCHW -> NHWC, spatial zero-pad (padding=1).
    x_nhwc = jnp.transpose(x_nchw, (0, 2, 3, 1))
    xp = jnp.pad(x_nhwc, ((0, 0), (1, 1), (1, 1), (0, 0)))

    # im2col: (M, 9*Cin), tap-major (kh, kw) then input channel, zero-padded to (Mp, Kp).
    taps = [xp[:, kh:kh + H, kw:kw + W, :] for kh in range(KH) for kw in range(KW)]
    patches = jnp.concatenate(taps, axis=-1).reshape(M, K)
    patches = jnp.pad(patches, ((0, Mp - M), (0, Kp - K)))

    # (Cout, Cin, KH, KW) -> (KH, KW, Cin, Cout) -> (K, Cout), zero-padded to (Kp, Cp).
    w2 = jnp.transpose(w_oihw, (2, 3, 1, 0)).reshape(K, Cout)
    w2 = jnp.pad(w2, ((0, Kp - K), (0, Cp - Cout)))
    gamma2 = jnp.pad(gamma.reshape(1, Cout), ((0, 0), (0, Cp - Cout)))
    beta2 = jnp.pad(beta.reshape(1, Cout), ((0, 0), (0, Cp - Cout)))

    # ---- pass 1: conv (single matmul per tile) + cross-tile BN sum / sumsq ----
    y2d, ch_sum, ch_sumsq = pl.pallas_call(
        conv_stats_kernel,
        out_shape=(
            jax.ShapeDtypeStruct((Mp, Cp), jnp.float32),
            jax.ShapeDtypeStruct((1, Cp), jnp.float32),
            jax.ShapeDtypeStruct((1, Cp), jnp.float32),
        ),
        grid=(n_tiles,),
        in_specs=[
            pl.BlockSpec((TM, Kp), lambda i: (i, 0)),
            pl.BlockSpec((Kp, Cp), lambda i: (0, 0)),
        ],
        out_specs=(
            pl.BlockSpec((TM, Cp), lambda i: (i, 0)),
            pl.BlockSpec((1, Cp), lambda i: (0, 0)),
            pl.BlockSpec((1, Cp), lambda i: (0, 0)),
        ),
        # The stats outputs are resident accumulators across the row axis -> "arbitrary".
        compiler_params=pltpu.CompilerParams(dimension_semantics=("arbitrary",)),
    )(patches, w2)

    # ---- pass 2: normalize + ReLU (fully parallel over row tiles; y buffer reused) ----
    out2d = pl.pallas_call(
        functools.partial(bn_relu_kernel, count=float(M)),
        out_shape=jax.ShapeDtypeStruct((Mp, Cp), jnp.float32),
        grid=(n_tiles,),
        in_specs=[
            pl.BlockSpec((TM, Cp), lambda i: (i, 0)),
            pl.BlockSpec((1, Cp), lambda i: (0, 0)),
            pl.BlockSpec((1, Cp), lambda i: (0, 0)),
            pl.BlockSpec((1, Cp), lambda i: (0, 0)),
            pl.BlockSpec((1, Cp), lambda i: (0, 0)),
        ],
        out_specs=pl.BlockSpec((TM, Cp), lambda i: (i, 0)),
        input_output_aliases={0: 0},
        compiler_params=pltpu.CompilerParams(dimension_semantics=("parallel",)),
    )(y2d, ch_sum, ch_sumsq, gamma2, beta2)

    out = out2d[:M, :Cout].reshape(N, H, W, Cout)
    return jnp.transpose(out, (0, 3, 1, 2))  # back to NCHW


def conv_block_reference(x_nchw, w_oihw, gamma, beta):
    """Pure-JAX reference (training-mode BN, biased variance, eps=1e-5)."""
    y = jax.lax.conv_general_dilated(
        x_nchw, w_oihw, window_strides=(1, 1), padding=((1, 1), (1, 1)),
        dimension_numbers=("NCHW", "OIHW", "NCHW"))
    mean = jnp.mean(y, axis=(0, 2, 3), keepdims=True)
    var = jnp.mean((y - mean) ** 2, axis=(0, 2, 3), keepdims=True)  # biased
    yn = (y - mean) * jax.lax.rsqrt(var + BN_EPS)
    yn = yn * gamma.reshape(1, -1, 1, 1) + beta.reshape(1, -1, 1, 1)
    return jnp.maximum(yn, 0.0)


if __name__ == "__main__":
    # Small shapes consistent with the module: batch=2, in_channels=4,
    # out_channels=8, spatial=16x16.
    N, Cin, Cout, H, W = 2, 4, 8, 16, 16

    key = jax.random.PRNGKey(0)
    kx, kw, kg, kb = jax.random.split(key, 4)

    x = jax.random.normal(kx, (N, Cin, H, W), dtype=jnp.float32)
    # Deterministic parameter init (synthetic, not a checkpoint load).
    w = jax.random.normal(kw, (Cout, Cin, KH, KW), dtype=jnp.float32) * 0.1
    gamma = 1.0 + 0.1 * jax.random.normal(kg, (Cout,), dtype=jnp.float32)
    beta = 0.1 * jax.random.normal(kb, (Cout,), dtype=jnp.float32)

    out = conv_block_forward(x, w, gamma, beta)
    out = jax.block_until_ready(out)

    ref = jax.block_until_ready(conv_block_reference(x, w, gamma, beta))
    assert out.shape == (N, Cout, H, W)
    assert jnp.allclose(out, ref, atol=1e-4, rtol=1e-4), "mismatch vs reference"

    print("KERNEL_OK")
</pallas_src>

<mosaic_0001>
module attributes {stable_mosaic.version = 11 : i64} {
  func.func @conv_stats_kernel(%arg0: i32, %arg1: memref<256x128xf32, #tpu.memory_space<vmem>>, %arg2: memref<128x128xf32, #tpu.memory_space<vmem>>, %arg3: memref<256x128xf32, #tpu.memory_space<vmem>>, %arg4: memref<1x128xf32, #tpu.memory_space<vmem>>, %arg5: memref<1x128xf32, #tpu.memory_space<vmem>>) attributes {dimension_semantics = [#tpu.dimension_semantics<arbitrary>], iteration_bounds = array<i64: 2>, scalar_prefetch = 0 : i64, scratch_operands = 0 : i64, tpu.core_type = #tpu.core_type<tc>, window_params = [{transform_indices = @transform_0, window_bounds = array<i64: 256, 128>}, {pipeline_mode = #tpu.pipeline_mode<synchronous>, transform_indices = @transform_1, window_bounds = array<i64: 128, 128>}, {transform_indices = @transform_2, window_bounds = array<i64: 256, 128>}, {pipeline_mode = #tpu.pipeline_mode<synchronous>, transform_indices = @transform_3, window_bounds = array<i64: 1, 128>}, {pipeline_mode = #tpu.pipeline_mode<synchronous>, transform_indices = @transform_4, window_bounds = array<i64: 1, 128>}]} {
    %c0_i32 = arith.constant 0 : i32
    %0 = arith.cmpi eq, %arg0, %c0_i32 : i32
    %1 = arith.extui %0 : i1 to i32
    %c0_i32_0 = arith.constant 0 : i32
    %2 = arith.cmpi ne, %1, %c0_i32_0 : i32
    scf.if %2 {
      %cst_16 = arith.constant 0.000000e+00 : f32
      %18 = vector.broadcast %cst_16 : f32 to vector<1x128xf32>
      %c0_17 = arith.constant 0 : index
      %c0_18 = arith.constant 0 : index
      %19 = vector.load %arg4[%c0_17, %c0_18] : memref<1x128xf32, #tpu.memory_space<vmem>>, vector<1x128xf32>
      tpu.vector_store %arg4[%c0_17, %c0_18], %18 {strides = array<i32>} : memref<1x128xf32, #tpu.memory_space<vmem>>, vector<1x128xf32>,
      %cst_19 = arith.constant 0.000000e+00 : f32
      %20 = vector.broadcast %cst_19 : f32 to vector<1x128xf32>
      %c0_20 = arith.constant 0 : index
      %c0_21 = arith.constant 0 : index
      %21 = vector.load %arg5[%c0_20, %c0_21] : memref<1x128xf32, #tpu.memory_space<vmem>>, vector<1x128xf32>
      tpu.vector_store %arg5[%c0_20, %c0_21], %20 {strides = array<i32>} : memref<1x128xf32, #tpu.memory_space<vmem>>, vector<1x128xf32>,
    } else {
    }
    %c0 = arith.constant 0 : index
    %c0_1 = arith.constant 0 : index
    %3 = vector.load %arg1[%c0, %c0_1] : memref<256x128xf32, #tpu.memory_space<vmem>>, vector<256x128xf32>
    %c0_2 = arith.constant 0 : index
    %c0_3 = arith.constant 0 : index
    %4 = vector.load %arg2[%c0_2, %c0_3] : memref<128x128xf32, #tpu.memory_space<vmem>>, vector<128x128xf32>
    %cst = arith.constant dense<0.000000e+00> : vector<256x128xf32>
    %5 = tpu.matmul %3, %4, %cst {dimension_numbers = #tpu.dot_dimension_numbers<[1], [0], [0], [1], [0, 0, 1, 1], [], []>} : vector<256x128xf32>, vector<128x128xf32>, vector<256x128xf32> -> vector<256x128xf32>
    %c0_4 = arith.constant 0 : index
    %c0_5 = arith.constant 0 : index
    %6 = vector.load %arg3[%c0_4, %c0_5] : memref<256x128xf32, #tpu.memory_space<vmem>>, vector<256x128xf32>
    tpu.vector_store %arg3[%c0_4, %c0_5], %5 {strides = array<i32>} : memref<256x128xf32, #tpu.memory_space<vmem>>, vector<256x128xf32>,
    %c0_6 = arith.constant 0 : index
    %c0_7 = arith.constant 0 : index
    %7 = vector.load %arg4[%c0_6, %c0_7] : memref<1x128xf32, #tpu.memory_space<vmem>>, vector<1x128xf32>
    %cst_8 = arith.constant dense<0.000000e+00> : vector<128xf32>
    %8 = vector.multi_reduction <add>, %5, %cst_8 [0] : vector<256x128xf32> to vector<128xf32>
    %9 = vector.shape_cast %8 : vector<128xf32> to vector<1x128xf32>
    %10 = arith.addf %7, %9 : vector<1x128xf32>
    %c0_9 = arith.constant 0 : index
    %c0_10 = arith.constant 0 : index
    %11 = vector.load %arg4[%c0_9, %c0_10] : memref<1x128xf32, #tpu.memory_space<vmem>>, vector<1x128xf32>
    tpu.vector_store %arg4[%c0_9, %c0_10], %10 {strides = array<i32>} : memref<1x128xf32, #tpu.memory_space<vmem>>, vector<1x128xf32>,
    %c0_11 = arith.constant 0 : index
    %c0_12 = arith.constant 0 : index
    %12 = vector.load %arg5[%c0_11, %c0_12] : memref<1x128xf32, #tpu.memory_space<vmem>>, vector<1x128xf32>
    %13 = arith.mulf %5, %5 : vector<256x128xf32>
    %cst_13 = arith.constant dense<0.000000e+00> : vector<128xf32>
    %14 = vector.multi_reduction <add>, %13, %cst_13 [0] : vector<256x128xf32> to vector<128xf32>
    %15 = vector.shape_cast %14 : vector<128xf32> to vector<1x128xf32>
    %16 = arith.addf %12, %15 : vector<1x128xf32>
    %c0_14 = arith.constant 0 : index
    %c0_15 = arith.constant 0 : index
    %17 = vector.load %arg5[%c0_14, %c0_15] : memref<1x128xf32, #tpu.memory_space<vmem>>, vector<1x128xf32>
    tpu.vector_store %arg5[%c0_14, %c0_15], %16 {strides = array<i32>} : memref<1x128xf32, #tpu.memory_space<vmem>>, vector<1x128xf32>,
    return
  }
  func.func @transform_0(%arg0: i32) -> (i32, i32) {
    %c0_i32 = arith.constant 0 : i32
    %c0_i32_0 = arith.constant 0 : i32
    return %arg0, %c0_i32 : i32, i32
  }
  func.func @transform_1(%arg0: i32) -> (i32, i32) {
    %c0_i32 = arith.constant 0 : i32
    %c0_i32_0 = arith.constant 0 : i32
    %c0_i32_1 = arith.constant 0 : i32
    return %c0_i32, %c0_i32_0 : i32, i32
  }
  func.func @transform_2(%arg0: i32) -> (i32, i32) {
    %c0_i32 = arith.constant 0 : i32
    %c0_i32_0 = arith.constant 0 : i32
    return %arg0, %c0_i32 : i32, i32
  }
  func.func @transform_3(%arg0: i32) -> (i32, i32) {
    %c0_i32 = arith.constant 0 : i32
    %c0_i32_0 = arith.constant 0 : i32
    %c0_i32_1 = arith.constant 0 : i32
    return %c0_i32, %c0_i32_0 : i32, i32
  }
  func.func @transform_4(%arg0: i32) -> (i32, i32) {
    %c0_i32 = arith.constant 0 : i32
    %c0_i32_0 = arith.constant 0 : i32
    %c0_i32_1 = arith.constant 0 : i32
    return %c0_i32, %c0_i32_0 : i32, i32
  }
}

</mosaic_0001>

<bundles_post_ra>
// kernel: tpu_custom_call.1
= control target key start
LH: loop header
LB: loop body
LE: loop exit
PB: predicated region body
PF: predicated region fallthrough
CT: control target
= control target key end

     0   :  { %10 = vsyncpa [#allocation3], 0  ;;  %s1631_s0 = inlined_call_operand.hbm [shape: f32[512,128], index: 0, kind: input, shape index: {}]   ;;  %s1632_s1 = inlined_call_operand.hbm [shape: f32[128,128], index: 1, kind: input, shape index: {}]   ;;  %s1633_s2 = inlined_call_operand.hbm [shape: f32[512,128], index: 2, kind: output, shape index: {0}]   ;;  %s1634_s3 = inlined_call_operand.hbm [shape: f32[1,128], index: 3, kind: output, shape index: {1}]   ;;  %s1635_s4 = inlined_call_operand.hbm [shape: f32[1,128], index: 4, kind: output, shape index: {2}]  }
   0x1   :  { %12 = vsyncpa [#allocation3 + $0x1], 0 }
   0x2   :  { %13 = vsyncpa [#allocation6], 0 }
   0x3   :  { %14 = vsyncpa [#allocation4], 0 }
   0x4   :  { %16 = vsyncpa [#allocation4 + $0x1], 0 }
   0x5   :  { %17 = vsyncpa [#allocation9], 0  ;;  %s1262_s15 = smov 0   ;;  %s1264_s16 = smov 0  }
   0x6   :  { %s1266_s17 = smov 0   ;;  %s1268_s18 = smov 0  }
   0x7 LB: > { %s1283_s19 = sadd.s32 4294967295, %s1225_s18   ;;  %s792_s20 = sadd.s32 4294967294, %s1225_s18   ;;  %s1225_s18 = sphi %s1268_s18, %s1664_s18   ;;  %s1221_s17 = sphi %s1266_s17, %s1663_s17   ;;  %s1217_s16 = sphi %s1264_s16, %s1662_s16   ;;  %s1213_s15 = sphi %s1262_s15, %s1661_s15  }
   0x8   : > { %p43_p0 = scmp.ne.s32.totalorder %s1217_s16, %s1213_s15  ;;  %p1636_p1 = scmp.eq.s32.totalorder %s1283_s19, 0 }
   0x9   : > { %p94_p3 = scmp.eq.s32.totalorder %s792_s20, 1  ;;  %p793_p5 = scmp.ge.s32.totalorder %s1225_s18, 1 }
   0xa   : > { %p1292_p4 = por %p1636_p1, %p43_p0  ;;  %p143_p7 = scmp.lt.s32.totalorder %s1225_s18, 3 }
   0xb   : > { %p1297_p6 = por %p94_p3, %p43_p0  ;;  %s1227_s24 = smov [#allocation5]  }
   0xc   : > { %s1640_s21 = scalar_select %p1292_p4, 1, 0 }
   0xd   : > { %s1641_s22 = scalar_select %p1297_p6, 1, 0 }
   0xe   : > { %p1303_p9 = pnand %p793_p5, %p143_p7  ;;  %s155_s25 = sshll.u32 %s1227_s24, 4  ;;  %s156_s25 = int_to_ptr.vmem [resolvable:$true] %s155_s25 }
   0xf   : > { %s1317_s27 = sadd.s32 1, %s1225_s18   ;;  %s30_s28 = sadd.s32 1, %s1221_s17 }
  0x10   : > { %s1642_s23 = scalar_select %p1303_p9, 1, 0 }
  0x11   : > { %p991_p10 = pneg %p1303_p9  ;;  %s27_s29 = ssub.s32 %s1225_s18, %s1317_s27 }
  0x12   : > { %s1062_s30 = scalar_lea.vmem %s156_s25, 2048  ;;  %p1070_p7 = scmp.lt.s32.totalorder %s156_s25, %s156_s25 }
  0x13   : > { %p1312_p12 = pnand %p991_p10, %p1636_p1  ;;  %p1063_p0 = scmp.ne.s32.totalorder %s156_s25, %s1062_s30 }
  0x14   : > { %p1071_p8 = scmp.lt.s32.totalorder %s1062_s30, %s1062_s30 }
  0x15   : > { %p1053_p13 = pneg %p1312_p12 }
  0x16   : > { %p1072_p11 = por %p1071_p8, %p1070_p7 }
  0x17   : > { %p1065_p3 = pnand %p1063_p0, %p1053_p13 }
  0x19   : > { %p1066_p5 = pneg %p1065_p3 }
  0x1b   : > { %p1073_p2 = pnand %p1072_p11, %p1066_p5 }
  0x1d   : > { %1076 = shalt.err (!%p1073_p2)
}
  0x1e   : > { %s1228_s5 = smov 128   ;;  %s1229_s6 = smov 8  }
  0x1f   : > { %994 = dma.hbm_to_vmem [thread:$0]  (!%p1312_p12), %s1632_s1, 2048, %s156_s25, [#allocation6], %s1228_s5, %s1228_s5, %s1229_s6  }
  0x20   : > { %p28_p2 = scmp.eq.s32.totalorder %s27_s29, 0  ;;  %p37_p8 = scmp.ne.s32.totalorder %s1221_s17, %s1217_s16 }
  0x21   : > { %p38_p10 = scmp.eq.s32.totalorder %s1225_s18, 0  ;;  %p1004_p11 = scmp.lt.s32.totalorder %s1225_s18, 2 }
  0x22   : > { %s1337_s9 = scalar_select %p28_p2, %s1221_s17, %s30_s28  }
  0x23   : > { %p39_p13 = por %p38_p10, %p37_p8  ;;  %p1644_p0 = scmp.eq.s32.totalorder %s1283_s19, 1 }
  0x24   : > { %s169_s11 = sand.u32 1, %s1221_s17   ;;  %s813_s12 = sshll.u32 %s1225_s18, 12 }
  0x25   : > { %p1341_p3 = por %p1644_p0, %p37_p8  ;;  %s796_s13 = sshll.u32 %s169_s11, 8 }
  0x26   : > { %s1350_s24 = scalar_lea.hbm %s1631_s0, %s813_s12  ;;  %s173_s25 = scalar_lea.vmem [#allocation2], %s796_s13 }
  0x27   : > { %s1645_s10 = scalar_select %p1341_p3, 1, 0 }
  0x28   : > { %s180_s26 = sshll.u32 %s173_s25, 4  ;;  %p1352_p12 = pnand %p1004_p11, %p39_p13  ;;  %s1356_s26 = int_to_ptr.vmem [resolvable:$true] %s180_s26 }
  0x29   : > { %s1358_s29 = scalar_lea.sflag [#allocation3], %s169_s11  ;;  %s1077_s30 = scalar_lea.hbm %s1350_s24, 4096 }
  0x2a   : > { %p1078_p5 = scmp.ne.s32.totalorder %s1350_s24, %s1077_s30  ;;  %p1079_p7 = pneg %p1352_p12 }
  0x2b   : > { %s1082_s12 = scalar_lea.hbm %s1631_s0, 8192  ;;  %p1083_p10 = scmp.lt.s32.totalorder %s1350_s24, %s1631_s0 }
  0x2c   : > { %p1080_p2 = pnand %p1079_p7, %p1078_p5  ;;  %p1084_p11 = scmp.lt.s32.totalorder %s1082_s12, %s1077_s30 }
  0x2e   : > { %p1081_p8 = pneg %p1080_p2  ;;  %p1085_p13 = por %p1084_p11, %p1083_p10 }
  0x30   : > { %p1086_p0 = pnand %p1085_p13, %p1081_p8 }
  0x32   : > { %1089 = shalt.err (!%p1086_p0)
}
  0x33   : > { %s1090_s11 = scalar_lea.vmem %s1356_s26, 4096  ;;  %s1230_s20 = smov [#allocation2]  }
  0x34   : > { %p1091_p1 = scmp.ne.s32.totalorder %s1356_s26, %s1090_s11  ;;  %s1095_s25 = sshll.u32 %s1230_s20, 4  ;;  %s1096_s25 = int_to_ptr.vmem [resolvable:$false] %s1095_s25 }
  0x35   : > { %s1097_s7 = scalar_lea.vmem %s1096_s25, 8192  ;;  %p1098_p2 = scmp.lt.s32.totalorder %s1356_s26, %s1096_s25 }
  0x36   : > { %p1093_p6 = pnand %p1091_p1, %p1079_p7  ;;  %p1099_p3 = scmp.lt.s32.totalorder %s1097_s7, %s1090_s11 }
  0x38   : > { %p1094_p5 = pneg %p1093_p6  ;;  %p1100_p4 = por %p1099_p3, %p1098_p2 }
  0x3a   : > { %p1101_p9 = pnand %p1100_p4, %p1094_p5 }
  0x3c   : > { %1104 = shalt.err (!%p1101_p9)
}
  0x3d   : > { %998 = dma.hbm_to_vmem [thread:$0]  (!%p1352_p12), %s1350_s24, 4096, %s1356_s26, %s1358_s29, %s1228_s5, %s1228_s5, %s1229_s6  }
  0x3e   : > { %p1647_p1 = scmp.ne.s32.totalorder %s1642_s23, 0 }
  0x3f   : > { %s1385_s30 = sand.u32 (!%p1647_p1), 1, %s1217_s16   ;;  %p1648_p4 = scmp.ne.s32.totalorder (!%p1647_p1), %s1640_s21, 0 }
  0x40   : > { %192 = sbr.rel (%p1647_p1) target bundleno = 418 (0x1a2), region = 28  ;;  %s800_s8 = sshll.u32 (!%p1647_p1), %s1385_s30, 8 }
  0x41   : > { %s195_s12 = scalar_lea.sflag (!%p1647_p1), [#allocation3], %s1385_s30  ;;  %s1389_s13 = scalar_lea.vmem (!%p1647_p1), [#allocation2], %s800_s8 }
  0x45   : > { %1196 = dma.done.wait (%p1648_p4), %s195_s12, 4096  }
  0x46   : > { %1198 = vsyncadd (%p1648_p4), %s195_s12, 4294963200  ;;  %p1649_p6 = scmp.eq.s32.totalorder %s1283_s19, 0 }
  0x48   : > { %1200 = dma.done.wait (%p1649_p6), [#allocation6], 2048   ;;  %p1650_p9 = pmov %p1649_p6 }
  0x49   : > { %s1399_s23 = scalar_lea.vmem [#allocation7], %s800_s8  ;;  %p1651_p3 = scmp.ne.s32.totalorder %s1283_s19, 0 }
  0x4a   : > { %1202 = vsyncadd (%p1650_p9), [#allocation6], 4294965248 }
  0x4b   : > { %232 = sbr.rel (%p1651_p3) target bundleno = 82 (0x52), region = 40 }
  0x50   : > { %v1231_v0 = vmov 0.0  }
  0x51   : > { %233 = vst [vmem:[#allocation8] sm:$0x1] %v1231_v0  ;;  %234 = vst [vmem:[#allocation10] sm:$0x1] %v1231_v0 }
  0x52 PF: > { %v282_v1 = vld [vmem:[#allocation5 + $0x78] sm:$0xff]  ;;  %v281_v2 = vld [vmem:[#allocation5 + $0x70] sm:$0xff]  ;;  %v280_v3 = vld [vmem:[#allocation5 + $0x68] sm:$0xff]  ;;  %s814_s21 = sshll.u32 %s1283_s19, 12  ;;  %s666_s5 = sshll.u32 %s1399_s23, 4  ;;  %s1515_s5 = int_to_ptr.vmem [resolvable:$true] %s666_s5 }
  0x53   : > { %863 = vmatprep.subr.mxu0 %v282_v1  ;;  %943 = vmatprep.subr.mxu1 %v282_v1  ;;  %v279_v4 = vld [vmem:[#allocation5 + $0x60] sm:$0xff]  ;;  %v278_v6 = vld [vmem:[#allocation5 + $0x58] sm:$0xff]  ;;  %v277_v7 = vld [vmem:[#allocation5 + $0x50] sm:$0xff]  ;;  %s1513_s26 = scalar_lea.hbm %s1633_s2, %s814_s21  ;;  %s653_s28 = scalar_lea.sflag [#allocation4], %s1385_s30 }
  0x54   : > { %864 = vmatpush3.msra.mxu0 %v282_v1  ;;  %959 = vmatpush3.msra.mxu1 %v282_v1  ;;  %v235_v5 = vld [vmem:[%s1389_s13] sm:$0xff]  ;;  %v276_v8 = vld [vmem:[#allocation5 + $0x48] sm:$0xff]  ;;  %v274_v10 = vld [vmem:[#allocation5 + $0x38] sm:$0xff]  ;;  %s1105_s29 = scalar_lea.vmem %s1515_s5, 4096  ;;  %p1652_p7 = scmp.ne.s32.totalorder %s1645_s10, 0 }
  0x55   : > { %865 = vmatprep.subr.mxu0 %v281_v2  ;;  %944 = vmatprep.subr.mxu1 %v281_v2  ;;  %v275_v9 = vld [vmem:[#allocation5 + $0x40] sm:$0xff]  ;;  %v273_v11 = vld [vmem:[#allocation5 + $0x30] sm:$0xff]  ;;  %v272_v12 = vld [vmem:[#allocation5 + $0x28] sm:$0xff]  ;;  %p1106_p12 = scmp.ne.s32.totalorder %s1515_s5, %s1105_s29  ;;  %s1232_s14 = smov [#allocation7]  }
  0x56   : > { %866 = vmatpush3.msra.mxu0 %v281_v2  ;;  %960 = vmatpush3.msra.mxu1 %v281_v2  ;;  %v271_v13 = vld [vmem:[#allocation5 + $0x20] sm:$0xff]  ;;  %v270_v14 = vld [vmem:[#allocation5 + $0x18] sm:$0xff]  ;;  %v269_v15 = vld [vmem:[#allocation5 + $0x10] sm:$0xff]  ;;  %s1109_s11 = sshll.u32 %s1232_s14, 4  ;;  %s1110_s11 = int_to_ptr.vmem [resolvable:$false] %s1109_s11 }
  0x57   : > { %867 = vmatprep.subr.mxu0 %v280_v3  ;;  %945 = vmatprep.subr.mxu1 %v280_v3  ;;  %v268_v16 = vld [vmem:[#allocation5 + $0x8] sm:$0xff]  ;;  %v267_v17 = vld [vmem:[#allocation5] sm:$0xff]  ;;  %v237_v19 = vld [vmem:[%s1389_s13 + $0x10] sm:$0xff]  ;;  %p1107_p8 = pnand %p1106_p12, %p1652_p7  ;;  %s1111_s20 = scalar_lea.vmem %s1110_s11, 8192 }
  0x58   : > { %868 = vmatpush3.msra.mxu0 %v280_v3  ;;  %895 = vmatprep.mubr.f32.mxu0 %v235_v5  ;;  %v236_v18 = vld [vmem:[%s1389_s13 + $0x8] sm:$0xff]  ;;  %v251_v20 = vld [vmem:[%s1389_s13 + $0x80] sm:$0xff]  ;;  %v253_v22 = vld [vmem:[%s1389_s13 + $0x90] sm:$0xff]  ;;  %p1112_p11 = scmp.lt.s32.totalorder %s1515_s5, %s1110_s11  ;;  %p1113_p13 = scmp.lt.s32.totalorder %s1111_s20, %s1105_s29 }
  0x59   : > { %869 = vmatprep.subr.mxu0 %v279_v4  ;;  %961 = vmatpush3.msra.mxu1 %v280_v3  ;;  %v252_v21 = vld [vmem:[%s1389_s13 + $0x88] sm:$0xff]  ;;  %v238_v23 = vld [vmem:[%s1389_s13 + $0x18] sm:$0xff]  ;;  %v239_v24 = vld [vmem:[%s1389_s13 + $0x20] sm:$0xff]  ;;  %p1108_p10 = pneg %p1107_p8 }
  0x5a   : > { %870 = vmatpush3.msra.mxu0 %v279_v4  ;;  %946 = vmatprep.subr.mxu1 %v279_v4  ;;  %v254_v25 = vld [vmem:[%s1389_s13 + $0x98] sm:$0xff]  ;;  %v255_v26 = vld [vmem:[%s1389_s13 + $0xa0] sm:$0xff]  ;;  %v240_v27 = vld [vmem:[%s1389_s13 + $0x28] sm:$0xff]  ;;  %p1114_p0 = por %p1113_p13, %p1112_p11 }
  0x5b   : > { %871 = vmatprep.subr.mxu0 %v278_v6  ;;  %962 = vmatpush3.msra.mxu1 %v279_v4  ;;  %v241_v28 = vld [vmem:[%s1389_s13 + $0x30] sm:$0xff]  ;;  %v256_v29 = vld [vmem:[%s1389_s13 + $0xa8] sm:$0xff]  ;;  %v242_v31 = vld [vmem:[%s1389_s13 + $0x38] sm:$0xff] }
  0x5c   : > { %872 = vmatpush3.msra.mxu0 %v278_v6  ;;  %947 = vmatprep.subr.mxu1 %v278_v6  ;;  %v257_v30 = vld [vmem:[%s1389_s13 + $0xb0] sm:$0xff]  ;;  %v243_v32 = vld [vmem:[%s1389_s13 + $0x40] sm:$0xff]  ;;  %v258_v33 = vld [vmem:[%s1389_s13 + $0xb8] sm:$0xff]  ;;  %p1115_p5 = pnand %p1114_p0, %p1108_p10 }
  0x5d   : > { %873 = vmatprep.subr.mxu0 %v277_v7  ;;  %963 = vmatpush3.msra.mxu1 %v278_v6  ;;  %v259_v34 = vld [vmem:[%s1389_s13 + $0xc0] sm:$0xff]  ;;  %v244_v35 = vld [vmem:[%s1389_s13 + $0x48] sm:$0xff]  ;;  %v245_v36 = vld [vmem:[%s1389_s13 + $0x50] sm:$0xff] }
  0x5e   : > { %874 = vmatpush3.msra.mxu0 %v277_v7  ;;  %948 = vmatprep.subr.mxu1 %v277_v7  ;;  %v260_v37 = vld [vmem:[%s1389_s13 + $0xc8] sm:$0xff]  ;;  %v261_v38 = vld [vmem:[%s1389_s13 + $0xd0] sm:$0xff]  ;;  %v246_v39 = vld [vmem:[%s1389_s13 + $0x58] sm:$0xff] }
  0x5f   : > { %875 = vmatprep.subr.mxu0 %v276_v8  ;;  %964 = vmatpush3.msra.mxu1 %v277_v7  ;;  %v247_v40 = vld [vmem:[%s1389_s13 + $0x60] sm:$0xff]  ;;  %v262_v41 = vld [vmem:[%s1389_s13 + $0xd8] sm:$0xff]  ;;  %v248_v43 = vld [vmem:[%s1389_s13 + $0x68] sm:$0xff] }
  0x60   : > { %876 = vmatpush3.msra.mxu0 %v276_v8  ;;  %949 = vmatprep.subr.mxu1 %v276_v8  ;;  %v263_v42 = vld [vmem:[%s1389_s13 + $0xe0] sm:$0xff]  ;;  %v249_v44 = vld [vmem:[%s1389_s13 + $0x70] sm:$0xff]  ;;  %v264_v45 = vld [vmem:[%s1389_s13 + $0xe8] sm:$0xff] }
  0x61   : > { %877 = vmatprep.subr.mxu0 %v275_v9  ;;  %965 = vmatpush3.msra.mxu1 %v276_v8  ;;  %v265_v46 = vld [vmem:[%s1389_s13 + $0xf0] sm:$0xff]  ;;  %v250_v47 = vld [vmem:[%s1389_s13 + $0x78] sm:$0xff] }
  0x62   : > { %878 = vmatpush3.msra.mxu0 %v275_v9  ;;  %950 = vmatprep.subr.mxu1 %v275_v9  ;;  %v266_v48 = vld [vmem:[%s1389_s13 + $0xf8] sm:$0xff] }
  0x63   : > { %879 = vmatprep.subr.mxu0 %v274_v10  ;;  %966 = vmatpush3.msra.mxu1 %v275_v9 }
  0x64   : > { %880 = vmatpush3.msra.mxu0 %v274_v10  ;;  %951 = vmatprep.subr.mxu1 %v274_v10 }
  0x65   : > { %881 = vmatprep.subr.mxu0 %v273_v11  ;;  %967 = vmatpush3.msra.mxu1 %v274_v10 }
  0x66   : > { %882 = vmatpush3.msra.mxu0 %v273_v11  ;;  %952 = vmatprep.subr.mxu1 %v273_v11 }
  0x67   : > { %883 = vmatprep.subr.mxu0 %v272_v12  ;;  %968 = vmatpush3.msra.mxu1 %v273_v11 }
  0x68   : > { %884 = vmatpush3.msra.mxu0 %v272_v12  ;;  %953 = vmatprep.subr.mxu1 %v272_v12 }
  0x69   : > { %885 = vmatprep.subr.mxu0 %v271_v13  ;;  %969 = vmatpush3.msra.mxu1 %v272_v12 }
  0x6a   : > { %886 = vmatpush3.msra.mxu0 %v271_v13  ;;  %954 = vmatprep.subr.mxu1 %v271_v13 }
  0x6b   : > { %887 = vmatprep.subr.mxu0 %v270_v14  ;;  %970 = vmatpush3.msra.mxu1 %v271_v13 }
  0x6c   : > { %888 = vmatpush3.msra.mxu0 %v270_v14  ;;  %955 = vmatprep.subr.mxu1 %v270_v14 }
  0x6d   : > { %889 = vmatprep.subr.mxu0 %v269_v15  ;;  %971 = vmatpush3.msra.mxu1 %v270_v14 }
  0x6e   : > { %890 = vmatpush3.msra.mxu0 %v269_v15  ;;  %956 = vmatprep.subr.mxu1 %v269_v15 }
  0x6f   : > { %891 = vmatprep.subr.mxu0 %v268_v16  ;;  %972 = vmatpush3.msra.mxu1 %v269_v15 }
  0x70   : > { %892 = vmatpush3.msra.mxu0 %v268_v16  ;;  %957 = vmatprep.subr.mxu1 %v268_v16 }
  0x71   : > { %893 = vmatprep.subr.mxu0 %v267_v17  ;;  %973 = vmatpush3.msra.mxu1 %v268_v16 }
  0x72   : > { %894 = vmatpush3.msra.mxu0 %v267_v17  ;;  %958 = vmatprep.subr.mxu1 %v267_v17 }
  0x73   : > { %896 = vmatmul.mubr.f32.vlgmr.msra.gmra.mxu0 %v236_v18  ;;  %974 = vmatpush3.msra.mxu1 %v267_v17 }
  0x74   : > { %898 = vmatprep.mubr.f32.mxu0 %v237_v19  ;;  %919 = vmatprep.mubr.f32.mxu1 %v251_v20 }
  0x75   : > { %920 = vmatmul.mubr.f32.vlgmr.msra.gmra.mxu1 %v252_v21 }
  0x76   : > { %922 = vmatprep.mubr.f32.mxu1 %v253_v22 }
  0x77   : > { %899 = vmatmul.mubr.f32.gmra.mxu0 %v238_v23 }
  0x78   : > { %901 = vmatprep.mubr.f32.mxu0 %v239_v24 }
  0x79   : > { %923 = vmatmul.mubr.f32.gmra.mxu1 %v254_v25 }
  0x7a   : > { %925 = vmatprep.mubr.f32.mxu1 %v255_v26 }
  0x7b   : > { %902 = vmatmul.mubr.f32.gmra.mxu0 %v240_v27 }
  0x7c   : > { %904 = vmatprep.mubr.f32.mxu0 %v241_v28 }
  0x7d   : > { %926 = vmatmul.mubr.f32.gmra.mxu1 %v256_v29 }
  0x7e   : > { %928 = vmatprep.mubr.f32.mxu1 %v257_v30 }
  0x7f   : > { %905 = vmatmul.mubr.f32.gmra.mxu0 %v242_v31 }
  0x80   : > { %907 = vmatprep.mubr.f32.mxu0 %v243_v32 }
  0x81   : > { %929 = vmatmul.mubr.f32.gmra.mxu1 %v258_v33 }
  0x82   : > { %931 = vmatprep.mubr.f32.mxu1 %v259_v34 }
  0x83   : > { %908 = vmatmul.mubr.f32.gmra.mxu0 %v244_v35 }
  0x84   : > { %910 = vmatprep.mubr.f32.mxu0 %v245_v36 }
  0x85   : > { %932 = vmatmul.mubr.f32.gmra.mxu1 %v260_v37 }
  0x86   : > { %934 = vmatprep.mubr.f32.mxu1 %v261_v38 }
  0x87   : > { %911 = vmatmul.mubr.f32.gmra.mxu0 %v246_v39 }
  0x88   : > { %913 = vmatprep.mubr.f32.mxu0 %v247_v40 }
  0x89   : > { %935 = vmatmul.mubr.f32.gmra.mxu1 %v262_v41 }
  0x8a   : > { %937 = vmatprep.mubr.f32.mxu1 %v263_v42 }
  0x8b   : > { %914 = vmatmul.mubr.f32.gmra.mxu0 %v248_v43 }
  0x8c   : > { %916 = vmatprep.mubr.f32.mxu0 %v249_v44 }
  0x8d   : > { %938 = vmatmul.mubr.f32.gmra.mxu1 %v264_v45 }
  0x8e   : > { %940 = vmatprep.mubr.f32.mxu1 %v265_v46 }
  0x8f   : > { %917 = vmatmul.mubr.f32.gmra.mxu0 %v250_v47 }
  0x91   : > { %941 = vmatmul.mubr.f32.gmra.mxu1 %v266_v48 }
 0x133   : > { %v897_v49 = vpop.f32.mrf.mxu0 }
 0x134   : > { %509 = vst [vmem:[%s1399_s23 + $0x8] sm:$0xff] %v897_v49  ;;  %v582_v55 = vmul.f32 %v897_v49, %v897_v49 }
 0x135   : > { %v349_v50 = vpop.f32.mrf.mxu0  ;;  %v1436_v51 = vpop.f32.mrf.mxu1 }
 0x136   : > { %508 = vst [vmem:[%s1399_s23] sm:$0xff] %v349_v50  ;;  %v581_v52 = vmul.f32 %v349_v50, %v349_v50  ;;  %525 = vst [vmem:[%s1399_s23 + $0x88] sm:$0xff] %v1436_v51  ;;  %v541_v56 = vadd.f32 %v897_v49, %v349_v50 }
 0x137   : > { %v900_v53 = vpop.f32.mrf.mxu0  ;;  %v1441_v54 = vpop.f32.mrf.mxu1 }
 0x138   : > { %511 = vst [vmem:[%s1399_s23 + $0x18] sm:$0xff] %v900_v53  ;;  %524 = vst [vmem:[%s1399_s23 + $0x80] sm:$0xff] %v1441_v54  ;;  %v613_v59 = vadd.f32 %v582_v55, %v581_v52  ;;  %v584_v0 = vmul.f32 %v900_v53, %v900_v53 }
 0x139   : > { %v359_v57 = vpop.f32.mrf.mxu0  ;;  %v1446_v58 = vpop.f32.mrf.mxu1 }
 0x13a   : > { %510 = vst [vmem:[%s1399_s23 + $0x10] sm:$0xff] %v359_v57  ;;  %v542_v60 = vadd.f32 %v541_v56, %v359_v57  ;;  %v583_v61 = vmul.f32 %v359_v57, %v359_v57  ;;  %527 = vst [vmem:[%s1399_s23 + $0x98] sm:$0xff] %v1446_v58 }
 0x13b   : > { %v903_v62 = vpop.f32.mrf.mxu0  ;;  %v1451_v63 = vpop.f32.mrf.mxu1 }
 0x13c   : > { %v614_v1 = vadd.f32 %v613_v59, %v583_v61  ;;  %513 = vst [vmem:[%s1399_s23 + $0x28] sm:$0xff] %v903_v62  ;;  %v543_v2 = vadd.f32 %v900_v53, %v542_v60  ;;  %526 = vst [vmem:[%s1399_s23 + $0x90] sm:$0xff] %v1451_v63  ;;  %v586_v10 = vmul.f32 %v903_v62, %v903_v62 }
 0x13d   : > { %v369_v3 = vpop.f32.mrf.mxu0  ;;  %v1456_v4 = vpop.f32.mrf.mxu1 }
 0x13e   : > { %512 = vst [vmem:[%s1399_s23 + $0x20] sm:$0xff] %v369_v3  ;;  %v544_v5 = vadd.f32 %v543_v2, %v369_v3  ;;  %v585_v6 = vmul.f32 %v369_v3, %v369_v3  ;;  %v615_v7 = vadd.f32 %v614_v1, %v584_v0  ;;  %529 = vst [vmem:[%s1399_s23 + $0xa8] sm:$0xff] %v1456_v4 }
 0x13f   : > { %v906_v8 = vpop.f32.mrf.mxu0  ;;  %v1461_v9 = vpop.f32.mrf.mxu1 }
 0x140   : > { %v616_v11 = vadd.f32 %v615_v7, %v585_v6  ;;  %515 = vst [vmem:[%s1399_s23 + $0x38] sm:$0xff] %v906_v8  ;;  %v545_v12 = vadd.f32 %v903_v62, %v544_v5  ;;  %528 = vst [vmem:[%s1399_s23 + $0xa0] sm:$0xff] %v1461_v9  ;;  %v588_v20 = vmul.f32 %v906_v8, %v906_v8 }
 0x141   : > { %v379_v13 = vpop.f32.mrf.mxu0  ;;  %v1466_v14 = vpop.f32.mrf.mxu1 }
 0x142   : > { %514 = vst [vmem:[%s1399_s23 + $0x30] sm:$0xff] %v379_v13  ;;  %v546_v15 = vadd.f32 %v545_v12, %v379_v13  ;;  %v587_v16 = vmul.f32 %v379_v13, %v379_v13  ;;  %v617_v17 = vadd.f32 %v616_v11, %v586_v10  ;;  %531 = vst [vmem:[%s1399_s23 + $0xb8] sm:$0xff] %v1466_v14 }
 0x143   : > { %v909_v18 = vpop.f32.mrf.mxu0  ;;  %v1471_v19 = vpop.f32.mrf.mxu1 }
 0x144   : > { %v618_v21 = vadd.f32 %v617_v17, %v587_v16  ;;  %517 = vst [vmem:[%s1399_s23 + $0x48] sm:$0xff] %v909_v18  ;;  %v547_v22 = vadd.f32 %v906_v8, %v546_v15  ;;  %530 = vst [vmem:[%s1399_s23 + $0xb0] sm:$0xff] %v1471_v19  ;;  %v590_v30 = vmul.f32 %v909_v18, %v909_v18 }
 0x145   : > { %v389_v23 = vpop.f32.mrf.mxu0  ;;  %v1476_v24 = vpop.f32.mrf.mxu1 }
 0x146   : > { %516 = vst [vmem:[%s1399_s23 + $0x40] sm:$0xff] %v389_v23  ;;  %v548_v25 = vadd.f32 %v547_v22, %v389_v23  ;;  %v589_v26 = vmul.f32 %v389_v23, %v389_v23  ;;  %v619_v27 = vadd.f32 %v618_v21, %v588_v20  ;;  %533 = vst [vmem:[%s1399_s23 + $0xc8] sm:$0xff] %v1476_v24 }
 0x147   : > { %v912_v28 = vpop.f32.mrf.mxu0  ;;  %v1481_v29 = vpop.f32.mrf.mxu1 }
 0x148   : > { %v620_v31 = vadd.f32 %v619_v27, %v589_v26  ;;  %519 = vst [vmem:[%s1399_s23 + $0x58] sm:$0xff] %v912_v28  ;;  %v549_v32 = vadd.f32 %v909_v18, %v548_v25  ;;  %532 = vst [vmem:[%s1399_s23 + $0xc0] sm:$0xff] %v1481_v29  ;;  %v592_v40 = vmul.f32 %v912_v28, %v912_v28 }
 0x149   : > { %v399_v33 = vpop.f32.mrf.mxu0  ;;  %v1486_v34 = vpop.f32.mrf.mxu1 }
 0x14a   : > { %518 = vst [vmem:[%s1399_s23 + $0x50] sm:$0xff] %v399_v33  ;;  %v550_v35 = vadd.f32 %v549_v32, %v399_v33  ;;  %v591_v36 = vmul.f32 %v399_v33, %v399_v33  ;;  %v621_v37 = vadd.f32 %v620_v31, %v590_v30  ;;  %535 = vst [vmem:[%s1399_s23 + $0xd8] sm:$0xff] %v1486_v34 }
 0x14b   : > { %v915_v38 = vpop.f32.mrf.mxu0  ;;  %v1491_v39 = vpop.f32.mrf.mxu1 }
 0x14c   : > { %v622_v41 = vadd.f32 %v621_v37, %v591_v36  ;;  %521 = vst [vmem:[%s1399_s23 + $0x68] sm:$0xff] %v915_v38  ;;  %v551_v42 = vadd.f32 %v912_v28, %v550_v35  ;;  %534 = vst [vmem:[%s1399_s23 + $0xd0] sm:$0xff] %v1491_v39  ;;  %v594_v50 = vmul.f32 %v915_v38, %v915_v38 }
 0x14d   : > { %v409_v43 = vpop.f32.mrf.mxu0  ;;  %v1496_v44 = vpop.f32.mrf.mxu1 }
 0x14e   : > { %520 = vst [vmem:[%s1399_s23 + $0x60] sm:$0xff] %v409_v43  ;;  %v552_v45 = vadd.f32 %v551_v42, %v409_v43  ;;  %v593_v46 = vmul.f32 %v409_v43, %v409_v43  ;;  %v623_v47 = vadd.f32 %v622_v41, %v592_v40  ;;  %537 = vst [vmem:[%s1399_s23 + $0xe8] sm:$0xff] %v1496_v44 }
 0x14f   : > { %v918_v48 = vpop.f32.mrf.mxu0  ;;  %v1503_v49 = vpop.f32.mrf.mxu1 }
 0x150   : > { %v624_v52 = vadd.f32 %v623_v47, %v593_v46  ;;  %523 = vst [vmem:[%s1399_s23 + $0x78] sm:$0xff] %v918_v48  ;;  %v553_v53 = vadd.f32 %v915_v38, %v552_v45  ;;  %536 = vst [vmem:[%s1399_s23 + $0xe0] sm:$0xff] %v1503_v49  ;;  %v596_v62 = vmul.f32 %v918_v48, %v918_v48 }
 0x151   : > { %v419_v55 = vpop.f32.mrf.mxu0  ;;  %v1508_v56 = vpop.f32.mrf.mxu1 }
 0x152   : > { %522 = vst [vmem:[%s1399_s23 + $0x70] sm:$0xff] %v419_v55  ;;  %v554_v57 = vadd.f32 %v553_v53, %v419_v55  ;;  %v595_v59 = vmul.f32 %v419_v55, %v419_v55  ;;  %v625_v60 = vadd.f32 %v624_v52, %v594_v50  ;;  %539 = vst [vmem:[%s1399_s23 + $0xf8] sm:$0xff] %v1508_v56 }
 0x153   : > { %v1520_v61 = vpop.f32.mrf.mxu1 }
 0x154   : > { %v555_v0 = vadd.f32 %v918_v48, %v554_v57  ;;  %v626_v1 = vadd.f32 %v625_v60, %v595_v59  ;;  %538 = vst [vmem:[%s1399_s23 + $0xf0] sm:$0xff] %v1520_v61 }
 0x155   : > { %1118 = shalt.err (!%p1115_p5)
}
 0x156   : > { %s1119_s25 = scalar_lea.hbm %s1513_s26, 4096  ;;  %s1123_s12 = scalar_lea.hbm %s1633_s2, 8192 }
 0x157   : > { %p1120_p2 = scmp.ne.s32.totalorder %s1513_s26, %s1119_s25  ;;  %p1124_p6 = scmp.lt.s32.totalorder %s1513_s26, %s1633_s2 }
 0x158   : > { %p1125_p9 = scmp.lt.s32.totalorder %s1123_s12, %s1119_s25 }
 0x159   : > { %p1121_p1 = pnand %p1120_p2, %p1652_p7 }
 0x15a   : > { %p1126_p3 = por %p1125_p9, %p1124_p6 }
 0x15b   : > { %p1122_p4 = pneg %p1121_p1 }
 0x15d   : > { %p1127_p12 = pnand %p1126_p3, %p1122_p4 }
 0x15f   : > { %1130 = shalt.err (!%p1127_p12)
}
 0x160   : > { %s1233_s21 = smov 128   ;;  %s1234_s6 = smov 8   ;;  %v627_v2 = vadd.f32 %v626_v1, %v596_v62  ;;  %v556_v3 = vadd.f32 %v555_v0, %v1441_v54  ;;  %v597_v5 = vmul.f32 %v1441_v54, %v1441_v54  ;;  %v598_v6 = vmul.f32 %v1436_v51, %v1436_v51  ;;  %v540_v60 = vld [vmem:[#allocation8] sm:$0x1]  ;;  %v580_v0 = vld [vmem:[#allocation10] sm:$0x1] }
 0x161   : > { %981 = dma.vmem_to_hbm [thread:$0]  (%p1652_p7), %s1515_s5, 4096, %s1513_s26, %s653_s28, %s1233_s21, %s1233_s21, %s1234_s6   ;;  %v599_v11 = vmul.f32 %v1451_v63, %v1451_v63  ;;  %v600_v13 = vmul.f32 %v1446_v58, %v1446_v58  ;;  %v601_v17 = vmul.f32 %v1461_v9, %v1461_v9  ;;  %v603_v22 = vmul.f32 %v1471_v19, %v1471_v19 }
 0x162   : > { %v628_v7 = vadd.f32 %v627_v2, %v597_v5  ;;  %v557_v8 = vadd.f32 %v1436_v51, %v556_v3  ;;  %v602_v51 = vmul.f32 %v1456_v4, %v1456_v4  ;;  %v605_v27 = vmul.f32 %v1481_v29, %v1481_v29  ;;  %s1235_s10 = smov [#allocation8]   ;;  %s1236_s5 = smov [#allocation10]  }
 0x163   : > { %v607_v32 = vmul.f32 %v1491_v39, %v1491_v39  ;;  %v609_v37 = vmul.f32 %v1503_v49, %v1503_v49  ;;  %v611_v42 = vmul.f32 %v1520_v61, %v1520_v61  ;;  %s680_s30 = sshll.u32 %s1235_s10, 4  ;;  %s691_s24 = sshll.u32 %s1236_s5, 4  ;;  %s681_s30 = int_to_ptr.vmem [resolvable:$true] %s680_s30  ;;  %s692_s24 = int_to_ptr.vmem [resolvable:$true] %s691_s24 }
 0x164   : > { %v558_v10 = vadd.f32 %v557_v8, %v1451_v63  ;;  %v629_v12 = vadd.f32 %v628_v7, %v598_v6  ;;  %s1131_s26 = scalar_lea.vmem %s681_s30, 16  ;;  %p1653_p8 = scmp.eq.s32.totalorder %s1283_s19, 1 }
 0x165   : > { %p1132_p7 = scmp.ne.s32.totalorder %s681_s30, %s1131_s26  ;;  %s1137_s28 = scalar_lea.vmem %s681_s30, 32 }
 0x166   : > { %v630_v15 = vadd.f32 %v629_v12, %v599_v11  ;;  %v559_v16 = vadd.f32 %v1446_v58, %v558_v10  ;;  %v604_v58 = vmul.f32 %v1466_v14, %v1466_v14  ;;  %p1138_p13 = scmp.lt.s32.totalorder %s681_s30, %s681_s30  ;;  %p1139_p0 = scmp.lt.s32.totalorder %s1137_s28, %s1131_s26 }
 0x167   : > { %p1133_p10 = pnand %p1132_p7, %p1653_p8 }
 0x168   : > { %v560_v54 = vadd.f32 %v559_v16, %v1461_v9  ;;  %v631_v18 = vadd.f32 %v630_v15, %v600_v13  ;;  %p1140_p5 = por %p1139_p0, %p1138_p13 }
 0x169   : > { %p1134_p11 = pneg %p1133_p10 }
 0x16a   : > { %v632_v20 = vadd.f32 %v631_v18, %v601_v17  ;;  %v561_v21 = vadd.f32 %v1456_v4, %v560_v54  ;;  %v606_v4 = vmul.f32 %v1476_v24, %v1476_v24 }
 0x16b   : > { %p1141_p2 = pnand %p1140_p5, %p1134_p11 }
 0x16c   : > { %v562_v63 = vadd.f32 %v561_v21, %v1471_v19  ;;  %v633_v23 = vadd.f32 %v632_v20, %v602_v51 }
 0x16e   : > { %v634_v25 = vadd.f32 %v633_v23, %v603_v22  ;;  %v563_v26 = vadd.f32 %v1466_v14, %v562_v63  ;;  %v608_v14 = vmul.f32 %v1486_v34, %v1486_v34 }
 0x170   : > { %v564_v9 = vadd.f32 %v563_v26, %v1481_v29  ;;  %v635_v28 = vadd.f32 %v634_v25, %v604_v58 }
 0x172   : > { %v636_v30 = vadd.f32 %v635_v28, %v605_v27  ;;  %v565_v31 = vadd.f32 %v1476_v24, %v564_v9  ;;  %v610_v24 = vmul.f32 %v1496_v44, %v1496_v44 }
 0x174   : > { %v566_v19 = vadd.f32 %v565_v31, %v1491_v39  ;;  %v637_v33 = vadd.f32 %v636_v30, %v606_v4 }
 0x176   : > { %v638_v35 = vadd.f32 %v637_v33, %v607_v32  ;;  %v567_v36 = vadd.f32 %v1486_v34, %v566_v19  ;;  %v612_v34 = vmul.f32 %v1508_v56, %v1508_v56 }
 0x178   : > { %v568_v29 = vadd.f32 %v567_v36, %v1503_v49  ;;  %v639_v38 = vadd.f32 %v638_v35, %v608_v14 }
 0x17a   : > { %v640_v40 = vadd.f32 %v639_v38, %v609_v37  ;;  %v569_v41 = vadd.f32 %v1496_v44, %v568_v29 }
 0x17c   : > { %v570_v39 = vadd.f32 %v569_v41, %v1520_v61  ;;  %v641_v43 = vadd.f32 %v640_v40, %v610_v24 }
 0x17e   : > { %v571_v45 = vadd.f32 %v1508_v56, %v570_v39  ;;  %v642_v46 = vadd.f32 %v641_v43, %v611_v42 }
 0x180   : > { %v572_v47 = vrot.slane %v571_v45, 4  ;;  %v643_v48 = vadd.f32 %v642_v46, %v612_v34 }
 0x182   : > { %v573_v49 = vadd.f32 %v572_v47, %v571_v45  ;;  %v644_v50 = vrot.slane %v643_v48, 4 }
 0x184   : > { %v574_v52 = vrot.slane %v573_v49, 2  ;;  %v645_v53 = vadd.f32 %v644_v50, %v643_v48 }
 0x186   : > { %v575_v55 = vadd.f32 %v574_v52, %v573_v49  ;;  %v646_v44 = vrot.slane %v645_v53, 2 }
 0x188   : > { %v576_v57 = vrot.slane %v575_v55, 1  ;;  %v647_v59 = vadd.f32 %v646_v44, %v645_v53 }
 0x18a   : > { %v577_v61 = vadd.f32 %v576_v57, %v575_v55  ;;  %v648_v62 = vrot.slane %v647_v59, 1 }
 0x18c   : > { %v578_v56 = vadd.f32 %v577_v61, %v540_v60  ;;  %v649_v1 = vadd.f32 %v648_v62, %v647_v59 }
 0x18e   : > { %579 = vst [vmem:[#allocation8] sm:$0x1] %v578_v56  ;;  %v650_v2 = vadd.f32 %v649_v1, %v580_v0 }
 0x18f   : > { %1144 = shalt.err (!%p1141_p2)
}
 0x190   : > { %p1654_p1 = pmov %p1653_p8  ;;  %651 = vst [vmem:[#allocation10] sm:$0x1] %v650_v2  ;;  %s1155_s11 = scalar_lea.vmem %s692_s24, 16 }
 0x191   : > { %p1156_p4 = scmp.ne.s32.totalorder %s692_s24, %s1155_s11  ;;  %s1161_s20 = scalar_lea.vmem %s692_s24, 32 }
 0x192   : > { %983 = dma.vmem_to_hbm [thread:$0]  (%p1654_p1), %s681_s30, 16, %s1634_s3, [#allocation9]  }
 0x193   : > { %p1655_p6 = pmov %p1654_p1  ;;  %p1162_p12 = scmp.lt.s32.totalorder %s692_s24, %s692_s24 }
 0x194   : > { %p1163_p7 = scmp.lt.s32.totalorder %s1161_s20, %s1155_s11 }
 0x195   : > { %p1157_p9 = pnand %p1156_p4, %p1655_p6 }
 0x196   : > { %p1164_p8 = por %p1163_p7, %p1162_p12 }
 0x197   : > { %p1158_p3 = pneg %p1157_p9 }
 0x199   : > { %p1165_p10 = pnand %p1164_p8, %p1158_p3 }
 0x19b   : > { %1168 = shalt.err (!%p1165_p10)
}
 0x19c   : > { %p1656_p11 = pmov %p1654_p1  ;;  %p1657_p13 = pmov %p1654_p1 }
 0x19e   : > { %985 = dma.vmem_to_hbm [thread:$0]  (%p1656_p11), %s692_s24, 16, %s1635_s4, [#allocation9]  }
 0x19f   : > { %1204 = dma.done.wait (%p1657_p13), [#allocation9], 32   ;;  %p1658_p0 = pmov %p1654_p1 }
 0x1a1   : > { %1206 = vsyncadd (%p1658_p0), [#allocation9], 4294967264 }
 0x1a2 PF: > { %s711_s8 = sand.u32 1, %s1213_s15   ;;  %p1659_p5 = scmp.ne.s32.totalorder %s1641_s22, 0 }
 0x1a3   : > { %p1660_p2 = scmp.ge.s32.totalorder %s1225_s18, 2  ;;  %s712_s12 = scalar_lea.sflag [#allocation4], %s711_s8 }
 0x1a5   : > { %p1000_p1 = pnand %p1660_p2, %p1659_p5 }
 0x1a7   : > { %p1001_p4 = pneg %p1000_p1 }
 0x1a9   : > { %1208 = dma.done.wait (%p1001_p4), %s712_s12, 4096  }
 0x1aa   : > { %1210 = vsyncadd (%p1001_p4), %s712_s12, 4294963200  ;;  %p20_p6 = scmp.ge.s32.totalorder %s1317_s27, 4   ;;  %s1661_s15 = smov %s1217_s16 }
 0x1ab   : > { %s1662_s16 = smov %s1221_s17  ;;  %s1663_s17 = smov %s1337_s9 }
 0x1ac   : > { %s1664_s18 = smov %s1317_s27  ;;  %22 = sbr.rel (!%p20_p6) target bundleno = 7 (0x7), region = 97 }
 0x1b1   :  { %717 = vsyncpa [#allocation3], 1 }
 0x1b2   :  { %719 = vsyncpa [#allocation3 + $0x1], 1 }
 0x1b3   :  { %720 = vsyncpa [#allocation6], 1 }
 0x1b4   :  { %721 = vsyncpa [#allocation4], 1 }
 0x1b5   :  { %723 = vsyncpa [#allocation4 + $0x1], 1 }
 0x1b6   :  { %724 = vsyncpa [#allocation9], 1 }

</bundles_post_ra>
